<compile_context>
chip_gen: v5e
topology: v5e:2x2
jax: 0.10.0
libtpu: 0.0.40
codegen_flags: <defaults>
</compile_context>

<pallas_src>
import jax
import jax.numpy as jnp
import numpy as np
from jax.experimental import pallas as pl
from jax.experimental.pallas import tpu as pltpu

EPS = 1e-5
_VMEM_LIMIT = 32 * 1024 * 1024


# ---------------------------------------------------------------------------
# Kernels
# ---------------------------------------------------------------------------
def _make_conv_kernel(H, W, Cin, Cout, fuse_bn_relu):
    """3x3 conv (pad=1, stride=1) for one image + BN partial sums.

    Activation layout inside the kernel: (H, W*Cin), (w, c) flattened on the
    lane axis.  Weights: three banded (W*Cin, W*Cout) matrices (one per kh
    tap); the W-axis zero padding is already folded into the bands.
    """

    def kernel(*refs):
        if fuse_bn_relu:
            (x_ref, scale_ref, shift_ref, w_ref,
             y_ref, s_ref, ss_ref, acc_ref) = refs
        else:
            x_ref, w_ref, y_ref, s_ref, ss_ref, acc_ref = refs

        a = x_ref[0]                                      # (H, W*Cin) f32
        if fuse_bn_relu:
            # BN of the previous conv + ReLU, fused into this conv's read path.
            a = jnp.maximum(a * scale_ref[...] + shift_ref[...], 0.0)
        ab = a.astype(jnp.bfloat16)                       # bf16 MXU operands

        # kh = 1 (same row) contribution.
        acc_ref[...] = jnp.dot(ab, w_ref[1],
                               preferred_element_type=jnp.float32)
        # kh = 0: x[h] contributes to out[h+1];  kh = 2: x[h] -> out[h-1].
        p0 = jnp.dot(ab, w_ref[0], preferred_element_type=jnp.float32)
        p2 = jnp.dot(ab, w_ref[2], preferred_element_type=jnp.float32)
        acc_ref[pl.ds(1, H - 1), :] = (acc_ref[pl.ds(1, H - 1), :]
                                       + p0[0:H - 1, :])
        acc_ref[pl.ds(0, H - 1), :] = (acc_ref[pl.ds(0, H - 1), :]
                                       + p2[1:H, :])

        acc = acc_ref[...]                                # (H, W*Cout) f32
        y_ref[0] = acc
        # Per-image BN partial sums (folded to per-channel in the wrapper).
        s_ref[0] = jnp.sum(acc, axis=0, keepdims=True)
        ss_ref[0] = jnp.sum(acc * acc, axis=0, keepdims=True)

    return kernel


def _epilogue_kernel(y_ref, res_ref, scale_ref, shift_ref, o_ref):
    y = y_ref[0] * scale_ref[...] + shift_ref[...]
    o_ref[0] = jnp.maximum(y + res_ref[0], 0.0)


# ---------------------------------------------------------------------------
# Pallas wrappers
# ---------------------------------------------------------------------------
def _conv_stage(x_flat, w_bands, H, W, Cin, Cout, scale=None, shift=None):
    """One fused conv stage over a per-image grid."""
    N = x_flat.shape[0]
    fused = scale is not None
    kernel = _make_conv_kernel(H, W, Cin, Cout, fused)

    img_in = pl.BlockSpec((1, H, W * Cin), lambda n: (n, 0, 0))
    vec_in = pl.BlockSpec((1, W * Cin), lambda n: (0, 0))
    w_spec = pl.BlockSpec((3, W * Cin, W * Cout), lambda n: (0, 0, 0))
    img_out = pl.BlockSpec((1, H, W * Cout), lambda n: (n, 0, 0))
    stat_out = pl.BlockSpec((1, 1, W * Cout), lambda n: (n, 0, 0))

    in_specs = [img_in] + ([vec_in, vec_in] if fused else []) + [w_spec]
    args = [x_flat] + ([scale, shift] if fused else []) + [w_bands]

    return pl.pallas_call(
        kernel,
        out_shape=(jax.ShapeDtypeStruct((N, H, W * Cout), jnp.float32),
                   jax.ShapeDtypeStruct((N, 1, W * Cout), jnp.float32),
                   jax.ShapeDtypeStruct((N, 1, W * Cout), jnp.float32)),
        grid=(N,),
        in_specs=in_specs,
        out_specs=(img_out, stat_out, stat_out),
        scratch_shapes=[pltpu.VMEM((H, W * Cout), jnp.float32)],
        compiler_params=pltpu.CompilerParams(
            dimension_semantics=("parallel",),
            vmem_limit_bytes=_VMEM_LIMIT),
    )(*args)


def _epilogue(y2_flat, x_flat, scale, shift, H, WC):
    N = y2_flat.shape[0]
    img = pl.BlockSpec((1, H, WC), lambda n: (n, 0, 0))
    vec = pl.BlockSpec((1, WC), lambda n: (0, 0))
    return pl.pallas_call(
        _epilogue_kernel,
        out_shape=jax.ShapeDtypeStruct((N, H, WC), jnp.float32),
        grid=(N,),
        in_specs=[img, img, vec, vec],
        out_specs=img,
        compiler_params=pltpu.CompilerParams(
            dimension_semantics=("parallel",),
            vmem_limit_bytes=_VMEM_LIMIT),
    )(y2_flat, x_flat, scale, shift)


# ---------------------------------------------------------------------------
# Wrapper-side helpers (tiny XLA ops between pallas_calls)
# ---------------------------------------------------------------------------
def _band_weights(w_oihw, W):
    """OIHW 3x3 weights -> 3 banded (W*Cin, W*Cout) bf16 matmul operands.

    band[kh][wi*Cin + ci, wo*Cout + co] = w[co, ci, kh, wi - wo + 1]
    (zero outside the 3-tap band == the W-axis zero padding of the conv).
    """
    Cout, Cin = int(w_oihw.shape[0]), int(w_oihw.shape[1])
    w_hwio = jnp.transpose(w_oihw, (2, 3, 1, 0))          # (3, 3, Cin, Cout)
    wi = jnp.arange(W)[:, None]
    wo = jnp.arange(W)[None, :]
    kw = wi - wo + 1
    valid = ((kw >= 0) & (kw <= 2)).astype(w_hwio.dtype)  # (W, W)
    kw_c = jnp.clip(kw, 0, 2)
    mats = []
    for kh in range(3):
        blk = w_hwio[kh][kw_c] * valid[:, :, None, None]  # (W, W, Cin, Cout)
        mats.append(jnp.transpose(blk, (0, 2, 1, 3)).reshape(W * Cin,
                                                             W * Cout))
    return jnp.stack(mats).astype(jnp.bfloat16)           # (3, W*Cin, W*Cout)


def _bn_scale_shift(s_part, ss_part, gamma, beta, count, W, C):
    """Fold per-image (1, W*C) partial sums into per-channel BN scale/shift,
    re-tiled to (1, W*C) for the lane-flattened activation layout."""
    tot = jnp.sum(s_part, axis=(0, 1)).reshape(W, C).sum(axis=0)
    tot2 = jnp.sum(ss_part, axis=(0, 1)).reshape(W, C).sum(axis=0)
    mean = tot / count
    var = tot2 / count - mean * mean        # biased variance (training mode)
    scale = gamma * jax.lax.rsqrt(var + EPS)
    shift = beta - mean * scale
    return (jnp.tile(scale, W).reshape(1, W * C),
            jnp.tile(shift, W).reshape(1, W * C))


# ---------------------------------------------------------------------------
# BasicBlock forward (NCHW in / NCHW out, like PyTorch)
# ---------------------------------------------------------------------------
@jax.jit
def basic_block_forward(x_nchw, params):
    N, C, H, W = x_nchw.shape
    count = N * H * W

    x_flat = jnp.transpose(x_nchw, (0, 2, 3, 1)).reshape(N, H, W * C)
    w1 = _band_weights(params["conv1_w"], W)
    w2 = _band_weights(params["conv2_w"], W)
    # conv biases intentionally dropped: exactly cancelled by the BN mean.

    y1, s1, ss1 = _conv_stage(x_flat, w1, H, W, C, C)
    scale1, shift1 = _bn_scale_shift(s1, ss1, params["bn1_g"],
                                     params["bn1_b"], count, W, C)

    y2, s2, ss2 = _conv_stage(y1, w2, H, W, C, C, scale=scale1, shift=shift1)
    scale2, shift2 = _bn_scale_shift(s2, ss2, params["bn2_g"],
                                     params["bn2_b"], count, W, C)

    out_flat = _epilogue(y2, x_flat, scale2, shift2, H, W * C)
    return jnp.transpose(out_flat.reshape(N, H, W, C), (0, 3, 1, 2))


# ---------------------------------------------------------------------------
# Pure-JAX reference (mirrors the PyTorch forward, NCHW, full f32 conv)
# ---------------------------------------------------------------------------
def reference_forward(x, params):
    def conv(x, w, b):
        y = jax.lax.conv_general_dilated(
            x, w, window_strides=(1, 1), padding=((1, 1), (1, 1)),
            dimension_numbers=("NCHW", "OIHW", "NCHW"),
            precision=jax.lax.Precision.HIGHEST)
        return y + b.reshape(1, -1, 1, 1)

    def bn(x, g, b):
        mean = jnp.mean(x, axis=(0, 2, 3), keepdims=True)
        var = jnp.mean((x - mean) ** 2, axis=(0, 2, 3), keepdims=True)
        return ((x - mean) * jax.lax.rsqrt(var + EPS) * g.reshape(1, -1, 1, 1)
                + b.reshape(1, -1, 1, 1))

    out = jnp.maximum(
        bn(conv(x, params["conv1_w"], params["conv1_b"]),
           params["bn1_g"], params["bn1_b"]), 0.0)
    out = bn(conv(out, params["conv2_w"], params["conv2_b"]),
             params["bn2_g"], params["bn2_b"])
    return jnp.maximum(out + x, 0.0)


# ---------------------------------------------------------------------------
# Main
# ---------------------------------------------------------------------------
if __name__ == "__main__":
    N, C, H, W = 2, 4, 16, 16          # in_channels == out_channels, stride=1
    key = jax.random.PRNGKey(0)
    kx, k1, k2, k3, k4, k5, k6, k7, k8 = jax.random.split(key, 9)

    x = jax.random.normal(kx, (N, C, H, W), jnp.float32)

    params = {
        "conv1_w": 0.1 * jax.random.normal(k1, (C, C, 3, 3), jnp.float32),
        "conv1_b": 0.1 * jax.random.normal(k2, (C,), jnp.float32),
        "bn1_g": 1.0 + 0.1 * jax.random.normal(k3, (C,), jnp.float32),
        "bn1_b": 0.1 * jax.random.normal(k4, (C,), jnp.float32),
        "conv2_w": 0.1 * jax.random.normal(k5, (C, C, 3, 3), jnp.float32),
        "conv2_b": 0.1 * jax.random.normal(k6, (C,), jnp.float32),
        "bn2_g": 1.0 + 0.1 * jax.random.normal(k7, (C,), jnp.float32),
        "bn2_b": 0.1 * jax.random.normal(k8, (C,), jnp.float32),
    }

    out = jax.block_until_ready(basic_block_forward(x, params))
    ref = jax.block_until_ready(reference_forward(x, params))

    assert out.shape == (N, C, H, W) and out.dtype == jnp.float32
    # bf16 MXU operands (f32 accumulation) per perf guidance -> loose atol.
    np.testing.assert_allclose(np.asarray(out), np.asarray(ref),
                               rtol=1e-2, atol=2e-2)
    print("KERNEL_OK")
</pallas_src>

<mosaic_0001>
module attributes {stable_mosaic.version = 11 : i64} {
  func.func @kernel(%arg0: i32, %arg1: memref<1x16x64xf32, #tpu.memory_space<vmem>>, %arg2: memref<3x64x64xbf16, #tpu.memory_space<vmem>>, %arg3: memref<1x16x64xf32, #tpu.memory_space<vmem>>, %arg4: memref<1x1x64xf32, #tpu.memory_space<vmem>>, %arg5: memref<1x1x64xf32, #tpu.memory_space<vmem>>, %arg6: memref<16x64xf32, #tpu.memory_space<vmem>>) attributes {dimension_semantics = [#tpu.dimension_semantics<parallel>], iteration_bounds = array<i64: 2>, scalar_prefetch = 0 : i64, scratch_operands = 1 : i64, tpu.core_type = #tpu.core_type<tc>, window_params = [{transform_indices = @transform_0, window_bounds = array<i64: 1, 16, 64>}, {pipeline_mode = #tpu.pipeline_mode<synchronous>, transform_indices = @transform_1, window_bounds = array<i64: 3, 64, 64>}, {transform_indices = @transform_2, window_bounds = array<i64: 1, 16, 64>}, {transform_indices = @transform_3, window_bounds = array<i64: 1, 1, 64>}, {transform_indices = @transform_4, window_bounds = array<i64: 1, 1, 64>}]} {
    %c0 = arith.constant 0 : index
    %c0_0 = arith.constant 0 : index
    %c0_1 = arith.constant 0 : index
    %0 = vector.load %arg1[%c0, %c0_0, %c0_1] : memref<1x16x64xf32, #tpu.memory_space<vmem>>, vector<1x16x64xf32>
    %1 = vector.shape_cast %0 : vector<1x16x64xf32> to vector<16x64xf32>
    %2 = arith.truncf %1 : vector<16x64xf32> to vector<16x64xbf16>
    %c1 = arith.constant 1 : index
    %c0_2 = arith.constant 0 : index
    %c0_3 = arith.constant 0 : index
    %3 = vector.load %arg2[%c1, %c0_2, %c0_3] : memref<3x64x64xbf16, #tpu.memory_space<vmem>>, vector<1x64x64xbf16>
    %4 = vector.shape_cast %3 : vector<1x64x64xbf16> to vector<64x64xbf16>
    %cst = arith.constant dense<0.000000e+00> : vector<16x64xf32>
    %5 = tpu.matmul %2, %4, %cst {dimension_numbers = #tpu.dot_dimension_numbers<[1], [0], [0], [1], [0, 0, 1, 1], [], []>} : vector<16x64xbf16>, vector<64x64xbf16>, vector<16x64xf32> -> vector<16x64xf32>
    %c0_4 = arith.constant 0 : index
    %c0_5 = arith.constant 0 : index
    %6 = vector.load %arg6[%c0_4, %c0_5] : memref<16x64xf32, #tpu.memory_space<vmem>>, vector<16x64xf32>
    tpu.vector_store %arg6[%c0_4, %c0_5], %5 {strides = array<i32>} : memref<16x64xf32, #tpu.memory_space<vmem>>, vector<16x64xf32>,
    %c0_6 = arith.constant 0 : index
    %c0_7 = arith.constant 0 : index
    %c0_8 = arith.constant 0 : index
    %7 = vector.load %arg2[%c0_6, %c0_7, %c0_8] : memref<3x64x64xbf16, #tpu.memory_space<vmem>>, vector<1x64x64xbf16>
    %8 = vector.shape_cast %7 : vector<1x64x64xbf16> to vector<64x64xbf16>
    %cst_9 = arith.constant dense<0.000000e+00> : vector<16x64xf32>
    %9 = tpu.matmul %2, %8, %cst_9 {dimension_numbers = #tpu.dot_dimension_numbers<[1], [0], [0], [1], [0, 0, 1, 1], [], []>} : vector<16x64xbf16>, vector<64x64xbf16>, vector<16x64xf32> -> vector<16x64xf32>
    %c2 = arith.constant 2 : index
    %c0_10 = arith.constant 0 : index
    %c0_11 = arith.constant 0 : index
    %10 = vector.load %arg2[%c2, %c0_10, %c0_11] : memref<3x64x64xbf16, #tpu.memory_space<vmem>>, vector<1x64x64xbf16>
    %11 = vector.shape_cast %10 : vector<1x64x64xbf16> to vector<64x64xbf16>
    %cst_12 = arith.constant dense<0.000000e+00> : vector<16x64xf32>
    %12 = tpu.matmul %2, %11, %cst_12 {dimension_numbers = #tpu.dot_dimension_numbers<[1], [0], [0], [1], [0, 0, 1, 1], [], []>} : vector<16x64xbf16>, vector<64x64xbf16>, vector<16x64xf32> -> vector<16x64xf32>
    %c1_13 = arith.constant 1 : index
    %c0_14 = arith.constant 0 : index
    %13 = vector.load %arg6[%c1_13, %c0_14] : memref<16x64xf32, #tpu.memory_space<vmem>>, vector<15x64xf32>
    %14 = vector.extract_strided_slice %9 {offsets = [0, 0], sizes = [15, 64], strides = [1, 1]} : vector<16x64xf32> to vector<15x64xf32>
    %15 = arith.addf %13, %14 : vector<15x64xf32>
    %c1_15 = arith.constant 1 : index
    %c0_16 = arith.constant 0 : index
    %16 = vector.load %arg6[%c1_15, %c0_16] : memref<16x64xf32, #tpu.memory_space<vmem>>, vector<15x64xf32>
    tpu.vector_store %arg6[%c1_15, %c0_16], %15 {strides = array<i32>} : memref<16x64xf32, #tpu.memory_space<vmem>>, vector<15x64xf32>,
    %c0_17 = arith.constant 0 : index
    %c0_18 = arith.constant 0 : index
    %17 = vector.load %arg6[%c0_17, %c0_18] : memref<16x64xf32, #tpu.memory_space<vmem>>, vector<15x64xf32>
    %18 = vector.extract_strided_slice %12 {offsets = [1, 0], sizes = [15, 64], strides = [1, 1]} : vector<16x64xf32> to vector<15x64xf32>
    %19 = arith.addf %17, %18 : vector<15x64xf32>
    %c0_19 = arith.constant 0 : index
    %c0_20 = arith.constant 0 : index
    %20 = vector.load %arg6[%c0_19, %c0_20] : memref<16x64xf32, #tpu.memory_space<vmem>>, vector<15x64xf32>
    tpu.vector_store %arg6[%c0_19, %c0_20], %19 {strides = array<i32>} : memref<16x64xf32, #tpu.memory_space<vmem>>, vector<15x64xf32>,
    %c0_21 = arith.constant 0 : index
    %c0_22 = arith.constant 0 : index
    %21 = vector.load %arg6[%c0_21, %c0_22] : memref<16x64xf32, #tpu.memory_space<vmem>>, vector<16x64xf32>
    %c0_23 = arith.constant 0 : index
    %c0_24 = arith.constant 0 : index
    %c0_25 = arith.constant 0 : index
    %22 = vector.load %arg3[%c0_23, %c0_24, %c0_25] : memref<1x16x64xf32, #tpu.memory_space<vmem>>, vector<1x16x64xf32>
    %23 = vector.shape_cast %22 : vector<1x16x64xf32> to vector<16x64xf32>
    %24 = vector.shape_cast %21 : vector<16x64xf32> to vector<1x16x64xf32>
    tpu.vector_store %arg3[%c0_23, %c0_24, %c0_25], %24 {strides = array<i32>} : memref<1x16x64xf32, #tpu.memory_space<vmem>>, vector<1x16x64xf32>,
    %cst_26 = arith.constant dense<0.000000e+00> : vector<64xf32>
    %25 = vector.multi_reduction <add>, %21, %cst_26 [0] : vector<16x64xf32> to vector<64xf32>
    %26 = vector.shape_cast %25 : vector<64xf32> to vector<1x64xf32>
    %c0_27 = arith.constant 0 : index
    %c0_28 = arith.constant 0 : index
    %c0_29 = arith.constant 0 : index
    %27 = vector.load %arg4[%c0_27, %c0_28, %c0_29] : memref<1x1x64xf32, #tpu.memory_space<vmem>>, vector<1x1x64xf32>
    %28 = vector.shape_cast %27 : vector<1x1x64xf32> to vector<1x64xf32>
    %29 = vector.shape_cast %26 : vector<1x64xf32> to vector<1x1x64xf32>
    tpu.vector_store %arg4[%c0_27, %c0_28, %c0_29], %29 {strides = array<i32>} : memref<1x1x64xf32, #tpu.memory_space<vmem>>, vector<1x1x64xf32>,
    %30 = arith.mulf %21, %21 : vector<16x64xf32>
    %cst_30 = arith.constant dense<0.000000e+00> : vector<64xf32>
    %31 = vector.multi_reduction <add>, %30, %cst_30 [0] : vector<16x64xf32> to vector<64xf32>
    %32 = vector.shape_cast %31 : vector<64xf32> to vector<1x64xf32>
    %c0_31 = arith.constant 0 : index
    %c0_32 = arith.constant 0 : index
    %c0_33 = arith.constant 0 : index
    %33 = vector.load %arg5[%c0_31, %c0_32, %c0_33] : memref<1x1x64xf32, #tpu.memory_space<vmem>>, vector<1x1x64xf32>
    %34 = vector.shape_cast %33 : vector<1x1x64xf32> to vector<1x64xf32>
    %35 = vector.shape_cast %32 : vector<1x64xf32> to vector<1x1x64xf32>
    tpu.vector_store %arg5[%c0_31, %c0_32, %c0_33], %35 {strides = array<i32>} : memref<1x1x64xf32, #tpu.memory_space<vmem>>, vector<1x1x64xf32>,
    return
  }
  func.func @transform_0(%arg0: i32) -> (i32, i32, i32) {
    %c0_i32 = arith.constant 0 : i32
    %c0_i32_0 = arith.constant 0 : i32
    %c0_i32_1 = arith.constant 0 : i32
    return %arg0, %c0_i32, %c0_i32_0 : i32, i32, i32
  }
  func.func @transform_1(%arg0: i32) -> (i32, i32, i32) {
    %c0_i32 = arith.constant 0 : i32
    %c0_i32_0 = arith.constant 0 : i32
    %c0_i32_1 = arith.constant 0 : i32
    %c0_i32_2 = arith.constant 0 : i32
    return %c0_i32, %c0_i32_0, %c0_i32_1 : i32, i32, i32
  }
  func.func @transform_2(%arg0: i32) -> (i32, i32, i32) {
    %c0_i32 = arith.constant 0 : i32
    %c0_i32_0 = arith.constant 0 : i32
    %c0_i32_1 = arith.constant 0 : i32
    return %arg0, %c0_i32, %c0_i32_0 : i32, i32, i32
  }
  func.func @transform_3(%arg0: i32) -> (i32, i32, i32) {
    %c0_i32 = arith.constant 0 : i32
    %c0_i32_0 = arith.constant 0 : i32
    %c0_i32_1 = arith.constant 0 : i32
    return %arg0, %c0_i32, %c0_i32_0 : i32, i32, i32
  }
  func.func @transform_4(%arg0: i32) -> (i32, i32, i32) {
    %c0_i32 = arith.constant 0 : i32
    %c0_i32_0 = arith.constant 0 : i32
    %c0_i32_1 = arith.constant 0 : i32
    return %arg0, %c0_i32, %c0_i32_0 : i32, i32, i32
  }
}

module attributes {stable_mosaic.version = 11 : i64} {
  func.func @kernel(%arg0: i32, %arg1: memref<1x16x64xf32, #tpu.memory_space<vmem>>, %arg2: memref<1x64xf32, #tpu.memory_space<vmem>>, %arg3: memref<1x64xf32, #tpu.memory_space<vmem>>, %arg4: memref<3x64x64xbf16, #tpu.memory_space<vmem>>, %arg5: memref<1x16x64xf32, #tpu.memory_space<vmem>>, %arg6: memref<1x1x64xf32, #tpu.memory_space<vmem>>, %arg7: memref<1x1x64xf32, #tpu.memory_space<vmem>>, %arg8: memref<16x64xf32, #tpu.memory_space<vmem>>) attributes {dimension_semantics = [#tpu.dimension_semantics<parallel>], iteration_bounds = array<i64: 2>, scalar_prefetch = 0 : i64, scratch_operands = 1 : i64, tpu.core_type = #tpu.core_type<tc>, window_params = [{transform_indices = @transform_0, window_bounds = array<i64: 1, 16, 64>}, {pipeline_mode = #tpu.pipeline_mode<synchronous>, transform_indices = @transform_1, window_bounds = array<i64: 1, 64>}, {pipeline_mode = #tpu.pipeline_mode<synchronous>, transform_indices = @transform_2, window_bounds = array<i64: 1, 64>}, {pipeline_mode = #tpu.pipeline_mode<synchronous>, transform_indices = @transform_3, window_bounds = array<i64: 3, 64, 64>}, {transform_indices = @transform_4, window_bounds = array<i64: 1, 16, 64>}, {transform_indices = @transform_5, window_bounds = array<i64: 1, 1, 64>}, {transform_indices = @transform_6, window_bounds = array<i64: 1, 1, 64>}]} {
    %c0 = arith.constant 0 : index
    %c0_0 = arith.constant 0 : index
    %c0_1 = arith.constant 0 : index
    %0 = vector.load %arg1[%c0, %c0_0, %c0_1] : memref<1x16x64xf32, #tpu.memory_space<vmem>>, vector<1x16x64xf32>
    %1 = vector.shape_cast %0 : vector<1x16x64xf32> to vector<16x64xf32>
    %c0_2 = arith.constant 0 : index
    %c0_3 = arith.constant 0 : index
    %2 = vector.load %arg2[%c0_2, %c0_3] : memref<1x64xf32, #tpu.memory_space<vmem>>, vector<1x64xf32>
    %3 = vector.broadcast %2 : vector<1x64xf32> to vector<16x64xf32>
    %4 = arith.mulf %1, %3 : vector<16x64xf32>
    %c0_4 = arith.constant 0 : index
    %c0_5 = arith.constant 0 : index
    %5 = vector.load %arg3[%c0_4, %c0_5] : memref<1x64xf32, #tpu.memory_space<vmem>>, vector<1x64xf32>
    %6 = vector.broadcast %5 : vector<1x64xf32> to vector<16x64xf32>
    %7 = arith.addf %4, %6 : vector<16x64xf32>
    %cst = arith.constant 0.000000e+00 : f32
    %8 = vector.broadcast %cst : f32 to vector<16x64xf32>
    %9 = arith.maximumf %7, %8 : vector<16x64xf32>
    %10 = arith.truncf %9 : vector<16x64xf32> to vector<16x64xbf16>
    %c1 = arith.constant 1 : index
    %c0_6 = arith.constant 0 : index
    %c0_7 = arith.constant 0 : index
    %11 = vector.load %arg4[%c1, %c0_6, %c0_7] : memref<3x64x64xbf16, #tpu.memory_space<vmem>>, vector<1x64x64xbf16>
    %12 = vector.shape_cast %11 : vector<1x64x64xbf16> to vector<64x64xbf16>
    %cst_8 = arith.constant dense<0.000000e+00> : vector<16x64xf32>
    %13 = tpu.matmul %10, %12, %cst_8 {dimension_numbers = #tpu.dot_dimension_numbers<[1], [0], [0], [1], [0, 0, 1, 1], [], []>} : vector<16x64xbf16>, vector<64x64xbf16>, vector<16x64xf32> -> vector<16x64xf32>
    %c0_9 = arith.constant 0 : index
    %c0_10 = arith.constant 0 : index
    %14 = vector.load %arg8[%c0_9, %c0_10] : memref<16x64xf32, #tpu.memory_space<vmem>>, vector<16x64xf32>
    tpu.vector_store %arg8[%c0_9, %c0_10], %13 {strides = array<i32>} : memref<16x64xf32, #tpu.memory_space<vmem>>, vector<16x64xf32>,
    %c0_11 = arith.constant 0 : index
    %c0_12 = arith.constant 0 : index
    %c0_13 = arith.constant 0 : index
    %15 = vector.load %arg4[%c0_11, %c0_12, %c0_13] : memref<3x64x64xbf16, #tpu.memory_space<vmem>>, vector<1x64x64xbf16>
    %16 = vector.shape_cast %15 : vector<1x64x64xbf16> to vector<64x64xbf16>
    %cst_14 = arith.constant dense<0.000000e+00> : vector<16x64xf32>
    %17 = tpu.matmul %10, %16, %cst_14 {dimension_numbers = #tpu.dot_dimension_numbers<[1], [0], [0], [1], [0, 0, 1, 1], [], []>} : vector<16x64xbf16>, vector<64x64xbf16>, vector<16x64xf32> -> vector<16x64xf32>
    %c2 = arith.constant 2 : index
    %c0_15 = arith.constant 0 : index
    %c0_16 = arith.constant 0 : index
    %18 = vector.load %arg4[%c2, %c0_15, %c0_16] : memref<3x64x64xbf16, #tpu.memory_space<vmem>>, vector<1x64x64xbf16>
    %19 = vector.shape_cast %18 : vector<1x64x64xbf16> to vector<64x64xbf16>
    %cst_17 = arith.constant dense<0.000000e+00> : vector<16x64xf32>
    %20 = tpu.matmul %10, %19, %cst_17 {dimension_numbers = #tpu.dot_dimension_numbers<[1], [0], [0], [1], [0, 0, 1, 1], [], []>} : vector<16x64xbf16>, vector<64x64xbf16>, vector<16x64xf32> -> vector<16x64xf32>
    %c1_18 = arith.constant 1 : index
    %c0_19 = arith.constant 0 : index
    %21 = vector.load %arg8[%c1_18, %c0_19] : memref<16x64xf32, #tpu.memory_space<vmem>>, vector<15x64xf32>
    %22 = vector.extract_strided_slice %17 {offsets = [0, 0], sizes = [15, 64], strides = [1, 1]} : vector<16x64xf32> to vector<15x64xf32>
    %23 = arith.addf %21, %22 : vector<15x64xf32>
    %c1_20 = arith.constant 1 : index
    %c0_21 = arith.constant 0 : index
    %24 = vector.load %arg8[%c1_20, %c0_21] : memref<16x64xf32, #tpu.memory_space<vmem>>, vector<15x64xf32>
    tpu.vector_store %arg8[%c1_20, %c0_21], %23 {strides = array<i32>} : memref<16x64xf32, #tpu.memory_space<vmem>>, vector<15x64xf32>,
    %c0_22 = arith.constant 0 : index
    %c0_23 = arith.constant 0 : index
    %25 = vector.load %arg8[%c0_22, %c0_23] : memref<16x64xf32, #tpu.memory_space<vmem>>, vector<15x64xf32>
    %26 = vector.extract_strided_slice %20 {offsets = [1, 0], sizes = [15, 64], strides = [1, 1]} : vector<16x64xf32> to vector<15x64xf32>
    %27 = arith.addf %25, %26 : vector<15x64xf32>
    %c0_24 = arith.constant 0 : index
    %c0_25 = arith.constant 0 : index
    %28 = vector.load %arg8[%c0_24, %c0_25] : memref<16x64xf32, #tpu.memory_space<vmem>>, vector<15x64xf32>
    tpu.vector_store %arg8[%c0_24, %c0_25], %27 {strides = array<i32>} : memref<16x64xf32, #tpu.memory_space<vmem>>, vector<15x64xf32>,
    %c0_26 = arith.constant 0 : index
    %c0_27 = arith.constant 0 : index
    %29 = vector.load %arg8[%c0_26, %c0_27] : memref<16x64xf32, #tpu.memory_space<vmem>>, vector<16x64xf32>
    %c0_28 = arith.constant 0 : index
    %c0_29 = arith.constant 0 : index
    %c0_30 = arith.constant 0 : index
    %30 = vector.load %arg5[%c0_28, %c0_29, %c0_30] : memref<1x16x64xf32, #tpu.memory_space<vmem>>, vector<1x16x64xf32>
    %31 = vector.shape_cast %30 : vector<1x16x64xf32> to vector<16x64xf32>
    %32 = vector.shape_cast %29 : vector<16x64xf32> to vector<1x16x64xf32>
    tpu.vector_store %arg5[%c0_28, %c0_29, %c0_30], %32 {strides = array<i32>} : memref<1x16x64xf32, #tpu.memory_space<vmem>>, vector<1x16x64xf32>,
    %cst_31 = arith.constant dense<0.000000e+00> : vector<64xf32>
    %33 = vector.multi_reduction <add>, %29, %cst_31 [0] : vector<16x64xf32> to vector<64xf32>
    %34 = vector.shape_cast %33 : vector<64xf32> to vector<1x64xf32>
    %c0_32 = arith.constant 0 : index
    %c0_33 = arith.constant 0 : index
    %c0_34 = arith.constant 0 : index
    %35 = vector.load %arg6[%c0_32, %c0_33, %c0_34] : memref<1x1x64xf32, #tpu.memory_space<vmem>>, vector<1x1x64xf32>
    %36 = vector.shape_cast %35 : vector<1x1x64xf32> to vector<1x64xf32>
    %37 = vector.shape_cast %34 : vector<1x64xf32> to vector<1x1x64xf32>
    tpu.vector_store %arg6[%c0_32, %c0_33, %c0_34], %37 {strides = array<i32>} : memref<1x1x64xf32, #tpu.memory_space<vmem>>, vector<1x1x64xf32>,
    %38 = arith.mulf %29, %29 : vector<16x64xf32>
    %cst_35 = arith.constant dense<0.000000e+00> : vector<64xf32>
    %39 = vector.multi_reduction <add>, %38, %cst_35 [0] : vector<16x64xf32> to vector<64xf32>
    %40 = vector.shape_cast %39 : vector<64xf32> to vector<1x64xf32>
    %c0_36 = arith.constant 0 : index
    %c0_37 = arith.constant 0 : index
    %c0_38 = arith.constant 0 : index
    %41 = vector.load %arg7[%c0_36, %c0_37, %c0_38] : memref<1x1x64xf32, #tpu.memory_space<vmem>>, vector<1x1x64xf32>
    %42 = vector.shape_cast %41 : vector<1x1x64xf32> to vector<1x64xf32>
    %43 = vector.shape_cast %40 : vector<1x64xf32> to vector<1x1x64xf32>
    tpu.vector_store %arg7[%c0_36, %c0_37, %c0_38], %43 {strides = array<i32>} : memref<1x1x64xf32, #tpu.memory_space<vmem>>, vector<1x1x64xf32>,
    return
  }
  func.func @transform_0(%arg0: i32) -> (i32, i32, i32) {
    %c0_i32 = arith.constant 0 : i32
    %c0_i32_0 = arith.constant 0 : i32
    %c0_i32_1 = arith.constant 0 : i32
    return %arg0, %c0_i32, %c0_i32_0 : i32, i32, i32
  }
  func.func @transform_1(%arg0: i32) -> (i32, i32) {
    %c0_i32 = arith.constant 0 : i32
    %c0_i32_0 = arith.constant 0 : i32
    %c0_i32_1 = arith.constant 0 : i32
    return %c0_i32, %c0_i32_0 : i32, i32
  }
  func.func @transform_2(%arg0: i32) -> (i32, i32) {
    %c0_i32 = arith.constant 0 : i32
    %c0_i32_0 = arith.constant 0 : i32
    %c0_i32_1 = arith.constant 0 : i32
    return %c0_i32, %c0_i32_0 : i32, i32
  }
  func.func @transform_3(%arg0: i32) -> (i32, i32, i32) {
    %c0_i32 = arith.constant 0 : i32
    %c0_i32_0 = arith.constant 0 : i32
    %c0_i32_1 = arith.constant 0 : i32
    %c0_i32_2 = arith.constant 0 : i32
    return %c0_i32, %c0_i32_0, %c0_i32_1 : i32, i32, i32
  }
  func.func @transform_4(%arg0: i32) -> (i32, i32, i32) {
    %c0_i32 = arith.constant 0 : i32
    %c0_i32_0 = arith.constant 0 : i32
    %c0_i32_1 = arith.constant 0 : i32
    return %arg0, %c0_i32, %c0_i32_0 : i32, i32, i32
  }
  func.func @transform_5(%arg0: i32) -> (i32, i32, i32) {
    %c0_i32 = arith.constant 0 : i32
    %c0_i32_0 = arith.constant 0 : i32
    %c0_i32_1 = arith.constant 0 : i32
    return %arg0, %c0_i32, %c0_i32_0 : i32, i32, i32
  }
  func.func @transform_6(%arg0: i32) -> (i32, i32, i32) {
    %c0_i32 = arith.constant 0 : i32
    %c0_i32_0 = arith.constant 0 : i32
    %c0_i32_1 = arith.constant 0 : i32
    return %arg0, %c0_i32, %c0_i32_0 : i32, i32, i32
  }
}

module attributes {stable_mosaic.version = 11 : i64} {
  func.func @_epilogue_kernel(%arg0: i32, %arg1: memref<1x16x64xf32, #tpu.memory_space<vmem>>, %arg2: memref<1x16x64xf32, #tpu.memory_space<vmem>>, %arg3: memref<1x64xf32, #tpu.memory_space<vmem>>, %arg4: memref<1x64xf32, #tpu.memory_space<vmem>>, %arg5: memref<1x16x64xf32, #tpu.memory_space<vmem>>) attributes {dimension_semantics = [#tpu.dimension_semantics<parallel>], iteration_bounds = array<i64: 2>, scalar_prefetch = 0 : i64, scratch_operands = 0 : i64, tpu.core_type = #tpu.core_type<tc>, window_params = [{transform_indices = @transform_0, window_bounds = array<i64: 1, 16, 64>}, {transform_indices = @transform_1, window_bounds = array<i64: 1, 16, 64>}, {pipeline_mode = #tpu.pipeline_mode<synchronous>, transform_indices = @transform_2, window_bounds = array<i64: 1, 64>}, {pipeline_mode = #tpu.pipeline_mode<synchronous>, transform_indices = @transform_3, window_bounds = array<i64: 1, 64>}, {transform_indices = @transform_4, window_bounds = array<i64: 1, 16, 64>}]} {
    %c0 = arith.constant 0 : index
    %c0_0 = arith.constant 0 : index
    %c0_1 = arith.constant 0 : index
    %0 = vector.load %arg1[%c0, %c0_0, %c0_1] : memref<1x16x64xf32, #tpu.memory_space<vmem>>, vector<1x16x64xf32>
    %1 = vector.shape_cast %0 : vector<1x16x64xf32> to vector<16x64xf32>
    %c0_2 = arith.constant 0 : index
    %c0_3 = arith.constant 0 : index
    %2 = vector.load %arg3[%c0_2, %c0_3] : memref<1x64xf32, #tpu.memory_space<vmem>>, vector<1x64xf32>
    %3 = vector.broadcast %2 : vector<1x64xf32> to vector<16x64xf32>
    %4 = arith.mulf %1, %3 : vector<16x64xf32>
    %c0_4 = arith.constant 0 : index
    %c0_5 = arith.constant 0 : index
    %5 = vector.load %arg4[%c0_4, %c0_5] : memref<1x64xf32, #tpu.memory_space<vmem>>, vector<1x64xf32>
    %6 = vector.broadcast %5 : vector<1x64xf32> to vector<16x64xf32>
    %7 = arith.addf %4, %6 : vector<16x64xf32>
    %c0_6 = arith.constant 0 : index
    %c0_7 = arith.constant 0 : index
    %c0_8 = arith.constant 0 : index
    %8 = vector.load %arg2[%c0_6, %c0_7, %c0_8] : memref<1x16x64xf32, #tpu.memory_space<vmem>>, vector<1x16x64xf32>
    %9 = vector.shape_cast %8 : vector<1x16x64xf32> to vector<16x64xf32>
    %10 = arith.addf %7, %9 : vector<16x64xf32>
    %cst = arith.constant 0.000000e+00 : f32
    %11 = vector.broadcast %cst : f32 to vector<16x64xf32>
    %12 = arith.maximumf %10, %11 : vector<16x64xf32>
    %c0_9 = arith.constant 0 : index
    %c0_10 = arith.constant 0 : index
    %c0_11 = arith.constant 0 : index
    %13 = vector.load %arg5[%c0_9, %c0_10, %c0_11] : memref<1x16x64xf32, #tpu.memory_space<vmem>>, vector<1x16x64xf32>
    %14 = vector.shape_cast %13 : vector<1x16x64xf32> to vector<16x64xf32>
    %15 = vector.shape_cast %12 : vector<16x64xf32> to vector<1x16x64xf32>
    tpu.vector_store %arg5[%c0_9, %c0_10, %c0_11], %15 {strides = array<i32>} : memref<1x16x64xf32, #tpu.memory_space<vmem>>, vector<1x16x64xf32>,
    return
  }
  func.func @transform_0(%arg0: i32) -> (i32, i32, i32) {
    %c0_i32 = arith.constant 0 : i32
    %c0_i32_0 = arith.constant 0 : i32
    %c0_i32_1 = arith.constant 0 : i32
    return %arg0, %c0_i32, %c0_i32_0 : i32, i32, i32
  }
  func.func @transform_1(%arg0: i32) -> (i32, i32, i32) {
    %c0_i32 = arith.constant 0 : i32
    %c0_i32_0 = arith.constant 0 : i32
    %c0_i32_1 = arith.constant 0 : i32
    return %arg0, %c0_i32, %c0_i32_0 : i32, i32, i32
  }
  func.func @transform_2(%arg0: i32) -> (i32, i32) {
    %c0_i32 = arith.constant 0 : i32
    %c0_i32_0 = arith.constant 0 : i32
    %c0_i32_1 = arith.constant 0 : i32
    return %c0_i32, %c0_i32_0 : i32, i32
  }
  func.func @transform_3(%arg0: i32) -> (i32, i32) {
    %c0_i32 = arith.constant 0 : i32
    %c0_i32_0 = arith.constant 0 : i32
    %c0_i32_1 = arith.constant 0 : i32
    return %c0_i32, %c0_i32_0 : i32, i32
  }
  func.func @transform_4(%arg0: i32) -> (i32, i32, i32) {
    %c0_i32 = arith.constant 0 : i32
    %c0_i32_0 = arith.constant 0 : i32
    %c0_i32_1 = arith.constant 0 : i32
    return %arg0, %c0_i32, %c0_i32_0 : i32, i32, i32
  }
}

</mosaic_0001>

<bundles_post_ra>
// kernel: tile.23
= control target key start
LH: loop header
LB: loop body
LE: loop exit
PB: predicated region body
PF: predicated region fallthrough
CT: control target
= control target key end

     0   :  { %s28_s0 = inlined_call_operand.vmem [shape: f32[4], index: 0, kind: input, shape index: {}]   ;;  %s29_s1 = inlined_call_operand.vmem [shape: f32[16,4], index: 1, kind: output, shape index: {}]  }
   0x1   :  { %v4_v0 = vld [vmem:[%s28_s0] ss:$0 sm:$0xff] }
   0x2   :  { %5 = vst [vmem:[%s29_s1] sm:$0xff] %v4_v0 }
   0x3   :  { %8 = vst [vmem:[%s29_s1 + $0x8] sm:$0xff] %v4_v0 }

// kernel: tile.24
= control target key start
LH: loop header
LB: loop body
LE: loop exit
PB: predicated region body
PF: predicated region fallthrough
CT: control target
= control target key end

     0   :  { %s131_s10 = smov 60   ;;  %s132_s11 = smov 52   ;;  %vm3_vm0 = vcmask 31744   ;;  %vm9_vm1 = vcmask 523744   ;;  %vm15_vm2 = vcmask 490944   ;;  %vm21_vm3 = vcmask 458144   ;;  %s207_s0 = inlined_call_operand.vmem [shape: f32[16,4], index: 0, kind: input, shape index: {}]   ;;  %s208_s1 = inlined_call_operand.vmem [shape: f32[1,64], index: 1, kind: output, shape index: {}]  }
   0x1   :  { %v101_v0 = vld [vmem:[%s207_s0 + $0xf] sm:$0x1]   ;;  %v103_v1 = vld [vmem:[%s207_s0 + $0xd] sm:$0x1]   ;;  %v105_v2 = vld [vmem:[%s207_s0 + $0xb] sm:$0x1]  }
   0x2   :  { %7 = vrot.lane.b32.xlu0 %v101_v0, %s131_s10  ;;  %19 = vrot.lane.b32.xlu1 %v103_v1, %s132_s11  ;;  %s133_s14 = smov 44   ;;  %v102_v3 = vld [vmem:[%s207_s0 + $0xe] sm:$0x1]   ;;  %v104_v4 = vld [vmem:[%s207_s0 + $0xc] sm:$0x1]   ;;  %s134_s19 = smov 56  }
   0x3   :  { %31 = vrot.lane.b32.xlu2 %v105_v2, %s133_s14  ;;  %s135_s20 = smov 48   ;;  %v106_v5 = vld [vmem:[%s207_s0 + $0xa] sm:$0x1]   ;;  %s136_s23 = smov 40   ;;  %v107_v6 = vld [vmem:[%s207_s0 + $0x9] sm:$0x1]  }
   0x4   :  { %v108_v7 = vld [vmem:[%s207_s0 + $0x8] sm:$0x1]   ;;  %s137_s28 = smov 36   ;;  %s138_s29 = smov 32   ;;  %v109_v8 = vld [vmem:[%s207_s0 + $0x7] sm:$0x1]  }
   0x5   :  { %s139_s3 = smov 28   ;;  %v110_v9 = vld [vmem:[%s207_s0 + $0x6] sm:$0x1]   ;;  %v111_v10 = vld [vmem:[%s207_s0 + $0x5] sm:$0x1]   ;;  %s140_s8 = smov 24  }
   0x6   :  { %s141_s9 = smov 20   ;;  %v112_v11 = vld [vmem:[%s207_s0 + $0x4] sm:$0x1]   ;;  %s142_s12 = smov 16   ;;  %v113_v12 = vld [vmem:[%s207_s0 + $0x3] sm:$0x1]  }
   0x7   :  { %v114_v13 = vld [vmem:[%s207_s0 + $0x2] sm:$0x1]   ;;  %s143_s17 = smov 12   ;;  %s144_s18 = smov 8   ;;  %v115_v14 = vld [vmem:[%s207_s0 + $0x1] sm:$0x1]  }
   0x8   :  { %s145_s21 = smov 4   ;;  %v2_v15 = vld [vmem:[%s207_s0] sm:$0x1]   ;;  %vm27_vm4 = vcmask 425344   ;;  %vm33_vm5 = vcmask 392544   ;;  %vm39_vm6 = vcmask 359744  }
   0x9   :  { %4 = vst.msk [vmem:[#allocation0] sm:$0x1] %vm3_vm0, %v2_v15   ;;  %vm45_vm7 = vcmask 326944   ;;  %vm51_vm8 = vcmask 294144   ;;  %vm57_vm9 = vcmask 261344   ;;  %vm63_vm10 = vcmask 228544  }
   0xa   :  { %13 = vrot.lane.b32.xlu0 %v102_v3, %s134_s19  ;;  %25 = vrot.lane.b32.xlu1 %v104_v4, %s135_s20  ;;  %vm69_vm11 = vcmask 195744   ;;  %vm75_vm12 = vcmask 162944   ;;  %vm81_vm13 = vcmask 130144   ;;  %vm87_vm14 = vcmask 97344  }
   0xb   :  { %37 = vrot.lane.b32.xlu2 %v106_v5, %s136_s23  ;;  %vm93_vm15 = vcmask 64544  }
  0x12   :  { %43 = vrot.lane.b32.xlu0 %v107_v6, %s137_s28  ;;  %49 = vrot.lane.b32.xlu1 %v108_v7, %s138_s29 }
  0x13   :  { %55 = vrot.lane.b32.xlu2 %v109_v8, %s139_s3 }
  0x1a   :  { %61 = vrot.lane.b32.xlu0 %v110_v9, %s140_s8  ;;  %67 = vrot.lane.b32.xlu1 %v111_v10, %s141_s9 }
  0x1b   :  { %73 = vrot.lane.b32.xlu2 %v112_v11, %s142_s12 }
  0x22   :  { %79 = vrot.lane.b32.xlu0 %v113_v12, %s143_s17  ;;  %85 = vrot.lane.b32.xlu1 %v114_v13, %s144_s18 }
  0x23   :  { %91 = vrot.lane.b32.xlu2 %v115_v14, %s145_s21 }
  0x5d   :  { %v32_v16 = vpop.permute.xlu2 %31  }
  0x65   :  { %v38_v17 = vpop.permute.xlu2 %37  }
  0x6d   :  { %v56_v18 = vpop.permute.xlu2 %55  }
  0x74   :  { %v8_v19 = vpop.permute.xlu0 %7   ;;  %v20_v20 = vpop.permute.xlu1 %19  }
  0x75   :  { %10 = vst.msk [vmem:[#allocation0] sm:$0x1] %vm9_vm1, %v8_v19   ;;  %v74_v21 = vpop.permute.xlu2 %73  }
  0x7c   :  { %v14_v22 = vpop.permute.xlu0 %13   ;;  %v26_v23 = vpop.permute.xlu1 %25  }
  0x7d   :  { %16 = vst.msk [vmem:[#allocation0] sm:$0x1] %vm15_vm2, %v14_v22   ;;  %v92_v24 = vpop.permute.xlu2 %91  }
  0x7e   :  { %22 = vst.msk [vmem:[#allocation0] sm:$0x1] %vm21_vm3, %v20_v20  }
  0x7f   :  { %28 = vst.msk [vmem:[#allocation0] sm:$0x1] %vm27_vm4, %v26_v23  }
  0x80   :  { %34 = vst.msk [vmem:[#allocation0] sm:$0x1] %vm33_vm5, %v32_v16  }
  0x81   :  { %40 = vst.msk [vmem:[#allocation0] sm:$0x1] %vm39_vm6, %v38_v17  }
  0x84   :  { %v44_v25 = vpop.permute.xlu0 %43   ;;  %v50_v26 = vpop.permute.xlu1 %49  }
  0x85   :  { %46 = vst.msk [vmem:[#allocation0] sm:$0x1] %vm45_vm7, %v44_v25  }
  0x86   :  { %52 = vst.msk [vmem:[#allocation0] sm:$0x1] %vm51_vm8, %v50_v26  }
  0x87   :  { %58 = vst.msk [vmem:[#allocation0] sm:$0x1] %vm57_vm9, %v56_v18  }
  0x8c   :  { %v62_v27 = vpop.permute.xlu0 %61   ;;  %v68_v28 = vpop.permute.xlu1 %67  }
  0x8d   :  { %64 = vst.msk [vmem:[#allocation0] sm:$0x1] %vm63_vm10, %v62_v27  }
  0x8e   :  { %70 = vst.msk [vmem:[#allocation0] sm:$0x1] %vm69_vm11, %v68_v28  }
  0x8f   :  { %76 = vst.msk [vmem:[#allocation0] sm:$0x1] %vm75_vm12, %v74_v21  }
  0x94   :  { %v80_v29 = vpop.permute.xlu0 %79   ;;  %v86_v30 = vpop.permute.xlu1 %85  }
  0x95   :  { %82 = vst.msk [vmem:[#allocation0] sm:$0x1] %vm81_vm13, %v80_v29  }
  0x96   :  { %88 = vst.msk [vmem:[#allocation0] sm:$0x1] %vm87_vm14, %v86_v30  }
  0x97   :  { %94 = vst.msk [vmem:[#allocation0] sm:$0x1] %vm93_vm15, %v92_v24  }
  0x9e   :  { %v97_v31 = vld [vmem:[#allocation0] sm:$0x1] }
  0x9f   :  { %100 = vst [vmem:[%s208_s1] sm:$0x1] %v97_v31 }

// kernel: basic_block_forward.3
= control target key start
LH: loop header
LB: loop body
LE: loop exit
PB: predicated region body
PF: predicated region fallthrough
CT: control target
= control target key end

     0   :  { %s651_s15 = smov 0   ;;  %s732_s0 = inlined_call_operand.vmem [shape: f32[2,16,64], index: 0, kind: input, shape index: {}]   ;;  %s733_s1 = inlined_call_operand.vmem [shape: bf16[3,64,64], index: 1, kind: input, shape index: {}]   ;;  %s734_s2 = inlined_call_operand.vmem [shape: f32[2,16,64], index: 2, kind: output, shape index: {0}]   ;;  %s735_s3 = inlined_call_operand.vmem [shape: f32[2,1,64], index: 3, kind: output, shape index: {1}]   ;;  %s736_s4 = inlined_call_operand.vmem [shape: f32[2,1,64], index: 4, kind: output, shape index: {2}]  }
   0x1 LB: > { %s518_s16 = sadd.s32 4294967295, %s624_s15   ;;  %p522_p0 = scmp.ge.s32.totalorder %s624_s15, 1  ;;  %s624_s15 = sphi %s651_s15, %s15_s15  }
   0x2   : > { %p167_p1 = scmp.lt.s32.totalorder %s624_s15, 3 }
   0x4   : > { %p168_p2 = pnand %p522_p0, %p167_p1 }
   0x5   : > { %p199_p3 = scmp.lt.s32.totalorder (!%p168_p2), %s518_s16, 1 }
   0x6   : > { %171 = sbr.rel (%p168_p2) target bundleno = 208 (0xd0), region = 28 }
   0xb   : > { %v601_v0 = vld [vmem:[%s733_s1 + $0x38] sm:$0xff]  ;;  %v600_v3 = vld [vmem:[%s733_s1 + $0x30] sm:$0xff]  ;;  %s738_s16 = smov (!%p199_p3, %s518_s16), 1  ;;  %v599_v6 = vld [vmem:[%s733_s1 + $0x28] sm:$0xff]  ;;  %vm252_vm0 = vcmask 523264   ;;  %vm370_vm1 = vcmask 522240  }
   0xc   : > { %v605_v1 = vld [vmem:[%s733_s1 + $0x18] sm:$0xff]  ;;  %260 = vmatpush.bf16.msra.mxu0 %v601_v0  ;;  %v604_v4 = vld [vmem:[%s733_s1 + $0x10] sm:$0xff]  ;;  %s596_s29 = sshll.u32 %s738_s16, 4  ;;  %v603_v7 = vld [vmem:[%s733_s1 + $0x8] sm:$0xff]  ;;  %vm376_vm2 = vcmask 1046528   ;;  %s211_s26 = scalar_lea.vmem %s735_s3, %s738_s16  ;;  %vm399_vm3 = vcmask 516096  }
   0xd   : > { %v609_v2 = vld [vmem:[%s733_s1 + $0x58] sm:$0xff]  ;;  %308 = vmatpush.bf16.msra.mxu1 %v605_v1  ;;  %v608_v5 = vld [vmem:[%s733_s1 + $0x50] sm:$0xff]  ;;  %v607_v8 = vld [vmem:[%s733_s1 + $0x48] sm:$0xff]  ;;  %s203_s12 = scalar_lea.vmem %s732_s0, %s596_s29  ;;  %s208_s23 = scalar_lea.vmem %s734_s2, %s596_s29 }
   0xe   : > { %355 = vmatpush.bf16.msra.mxu2 %v609_v2  ;;  %v598_v9 = vld [vmem:[%s733_s1 + $0x20] sm:$0xff]  ;;  %v217_v12 = vld [vmem:[%s203_s12 + $0x8] sm:$0xff]  ;;  %s214_s29 = scalar_lea.vmem %s736_s4, %s738_s16 }
   0xf   : > { %v602_v10 = vld [vmem:[%s733_s1] sm:$0xff] }
  0x10   : > { %261 = vmatpush.bf16.msra.mxu0 %v600_v3  ;;  %v216_v11 = vld [vmem:[%s203_s12] sm:$0xff] }
  0x11   : > { %309 = vmatpush.bf16.msra.mxu1 %v604_v4  ;;  %v606_v13 = vld [vmem:[%s733_s1 + $0x40] sm:$0xff]  ;;  %v218_v14 = vpack.c.bf16 %v217_v12, %v216_v11 }
  0x12   : > { %356 = vmatpush.bf16.msra.mxu2 %v608_v5 }
  0x14   : > { %262 = vmatpush.bf16.msra.mxu0 %v599_v6 }
  0x15   : > { %310 = vmatpush.bf16.msra.mxu1 %v603_v7 }
  0x16   : > { %357 = vmatpush.bf16.msra.mxu2 %v607_v8 }
  0x18   : > { %263 = vmatpush.bf16.msra.mxu0 %v598_v9 }
  0x19   : > { %311 = vmatpush.bf16.msra.mxu1 %v602_v10 }
  0x1a   : > { %358 = vmatpush.bf16.msra.mxu2 %v606_v13 }
  0x1b   : > { %551 = vmatmul.msk.bf16.vlgmr.msra.gmra.mxu0 %vm252_vm0, %v218_v14 }
  0x1c   : > { %568 = vmatmul.msk.bf16.vlgmr.msra.gmra.mxu1 %vm252_vm0, %v218_v14 }
  0x1d   : > { %593 = vmatmul.msk.bf16.vlgmr.msra.gmra.mxu2 %vm252_vm0, %v218_v14 }
  0x98   : > { %v265_v15 = vpop.f32.mrf.mxu0 }
  0x99   : > { %270 = vst.msk [vmem:[#allocation2] sm:$0xff] %vm252_vm0, %v265_v15  ;;  %v313_v16 = vpop.f32.mrf.mxu1 }
  0xa0   : > { %v267_v17 = vpop.f32.mrf.mxu0  ;;  %v360_v18 = vpop.f32.mrf.mxu2 }
  0xa1   : > { %271 = vst.msk [vmem:[#allocation2 + $0x8] sm:$0xff] %vm252_vm0, %v267_v17  ;;  %v315_v20 = vpop.f32.mrf.mxu1  ;;  %v377_v25 = vrot.slane %v360_v18, 1 }
  0xa8   : > { %v365_v19 = vld [vmem:[#allocation2 + $0x1] sm:$0xff]  ;;  %v366_v21 = vld [vmem:[#allocation2 + $0x9] sm:$0x7f]  ;;  %v362_v24 = vpop.f32.mrf.mxu2 }
  0xa9   : > { %v367_v22 = vadd.f32 %v365_v19, %v313_v16  ;;  %v368_v23 = vadd.f32 %v366_v21, %v315_v20  ;;  %v378_v26 = vrot.slane %v362_v24, 1 }
  0xab   : > { %369 = vst.msk [vmem:[#allocation2 + $0x1] sm:$0xff] %vm252_vm0, %v367_v22  ;;  %v379_v28 = vsel %vm376_vm2, %v377_v25, %v378_v26 }
  0xac   : > { %371 = vst.msk [vmem:[#allocation2 + $0x9] sm:$0x7f] %vm370_vm1, %v368_v23 }
  0xb2   : > { %v372_v27 = vld [vmem:[#allocation2] sm:$0xff] }
  0xb3   : > { %v373_v29 = vld [vmem:[#allocation2 + $0x8] sm:$0x7f]  ;;  %v382_v30 = vadd.f32 %v379_v28, %v372_v27 }
  0xb4   : > { %v383_v31 = vadd.f32 %v378_v26, %v373_v29 }
  0xb5   : > { %384 = vst.msk [vmem:[#allocation2] sm:$0xff] %vm252_vm0, %v382_v30 }
  0xb6   : > { %385 = vst.msk [vmem:[#allocation2 + $0x8] sm:$0x7f] %vm370_vm1, %v383_v31 }
  0xbc   : > { %v386_v32 = vld [vmem:[#allocation2] sm:$0xff] }
  0xbd   : > { %v387_v33 = vld [vmem:[#allocation2 + $0x8] sm:$0xff]  ;;  %388 = vst.msk [vmem:[%s208_s23] sm:$0xff] %vm252_vm0, %v386_v32  ;;  %v390_v34 = vsel %vm252_vm0, %v386_v32, 0.0  ;;  %v401_v35 = vmul.f32 %v386_v32, %v386_v32 }
  0xbe   : > { %389 = vst.msk [vmem:[%s208_s23 + $0x8] sm:$0xff] %vm252_vm0, %v387_v33  ;;  %v391_v36 = vsel %vm252_vm0, %v387_v33, 0.0  ;;  %v402_v37 = vmul.f32 %v387_v33, %v387_v33 }
  0xbf   : > { %v392_v38 = vadd.f32 %v391_v36, %v390_v34  ;;  %v403_v39 = vsel %vm252_vm0, %v401_v35, 0.0 }
  0xc0   : > { %v404_v40 = vsel %vm252_vm0, %v402_v37, 0.0 }
  0xc1   : > { %v393_v41 = vrot.slane %v392_v38, 4  ;;  %v405_v42 = vadd.f32 %v404_v40, %v403_v39 }
  0xc3   : > { %v394_v43 = vadd.f32 %v393_v41, %v392_v38  ;;  %v406_v44 = vrot.slane %v405_v42, 4 }
  0xc5   : > { %v395_v45 = vrot.slane %v394_v43, 2  ;;  %v407_v46 = vadd.f32 %v406_v44, %v405_v42 }
  0xc7   : > { %v396_v47 = vadd.f32 %v395_v45, %v394_v43  ;;  %v408_v48 = vrot.slane %v407_v46, 2 }
  0xc9   : > { %v397_v49 = vrot.slane %v396_v47, 1  ;;  %v409_v50 = vadd.f32 %v408_v48, %v407_v46 }
  0xcb   : > { %v398_v51 = vadd.f32 %v397_v49, %v396_v47  ;;  %v410_v52 = vrot.slane %v409_v50, 1 }
  0xcd   : > { %400 = vst.msk [vmem:[%s211_s26] sm:$0x1] %vm399_vm3, %v398_v51  ;;  %v411_v53 = vadd.f32 %v410_v52, %v409_v50 }
  0xcf   : > { %412 = vst.msk [vmem:[%s214_s29] sm:$0x1] %vm399_vm3, %v411_v53 }
  0xd0 PF: > { %s15_s15 = sadd.s32 1, %s624_s15  }
  0xd1   : > { %p12_p4 = scmp.ge.s32.totalorder %s15_s15, 4  }
  0xd3   :  { %14 = sbr.rel (!%p12_p4) target bundleno = 1 (0x1), region = 84 }

// kernel: basic_block_forward.5
= control target key start
LH: loop header
LB: loop body
LE: loop exit
PB: predicated region body
PF: predicated region fallthrough
CT: control target
= control target key end

     0   :  { %s367_s15 = smov 0   ;;  %s393_s0 = inlined_call_operand.vmem [shape: f32[2,16,64], index: 0, kind: input, shape index: {}]   ;;  %s394_s1 = inlined_call_operand.vmem [shape: f32[2,16,64], index: 1, kind: input, shape index: {}]   ;;  %s395_s2 = inlined_call_operand.vmem [shape: f32[1,64], index: 2, kind: input, shape index: {}]   ;;  %s396_s3 = inlined_call_operand.vmem [shape: f32[1,64], index: 3, kind: input, shape index: {}]   ;;  %s397_s4 = inlined_call_operand.vmem [shape: f32[2,16,64], index: 4, kind: output, shape index: {}]  }
   0x1 LB: > { %s308_s16 = sadd.s32 4294967295, %s340_s15   ;;  %p312_p0 = scmp.ge.s32.totalorder %s340_s15, 1  ;;  %s340_s15 = sphi %s367_s15, %s14_s15  }
   0x2   : > { %p172_p1 = scmp.lt.s32.totalorder %s340_s15, 3 }
   0x4   : > { %p173_p2 = pnand %p312_p0, %p172_p1 }
   0x5   : > { %p203_p3 = scmp.lt.s32.totalorder (!%p173_p2), %s308_s16, 1 }
   0x6   : > { %176 = sbr.rel (%p173_p2) target bundleno = 25 (0x19), region = 36 }
   0xb   : > { %s399_s16 = smov (!%p203_p3, %s308_s16), 1  ;;  %v332_v0 = vld [vmem:[%s395_s2] ss:$0 sm:$0xff]  ;;  %vm238_vm0 = vcmask 523264  }
   0xc   : > { %s321_s19 = sshll.u32 %s399_s16, 4  ;;  %v333_v1 = vld [vmem:[%s396_s3] ss:$0 sm:$0xff] }
   0xd   : > { %s207_s22 = scalar_lea.vmem %s393_s0, %s321_s19  ;;  %s212_s25 = scalar_lea.vmem %s394_s1, %s321_s19 }
   0xe   : > { %v218_v2 = vld [vmem:[%s207_s22] sm:$0xff]  ;;  %v219_v3 = vld [vmem:[%s207_s22 + $0x8] sm:$0xff]  ;;  %s217_s30 = scalar_lea.vmem %s397_s4, %s321_s19 }
   0xf   : > { %v224_v4 = vmul.f32 %v332_v0, %v218_v2  ;;  %v225_v5 = vmul.f32 %v332_v0, %v219_v3  ;;  %v232_v6 = vld [vmem:[%s212_s25] sm:$0xff]  ;;  %v233_v7 = vld [vmem:[%s212_s25 + $0x8] sm:$0xff] }
  0x11   : > { %v230_v8 = vadd.f32 %v333_v1, %v224_v4  ;;  %v231_v9 = vadd.f32 %v333_v1, %v225_v5 }
  0x13   : > { %v234_v10 = vadd.f32 %v232_v6, %v230_v8  ;;  %v235_v11 = vadd.f32 %v233_v7, %v231_v9 }
  0x15   : > { %v236_v12 = vmax.f32 %v234_v10, 0.0  ;;  %v237_v13 = vmax.f32 %v235_v11, 0.0 }
  0x17   : > { %239 = vst.msk [vmem:[%s217_s30] sm:$0xff] %vm238_vm0, %v236_v12 }
  0x18   : > { %240 = vst.msk [vmem:[%s217_s30 + $0x8] sm:$0xff] %vm238_vm0, %v237_v13 }
  0x19 PF: > { %s14_s15 = sadd.s32 1, %s340_s15  }
  0x1a   : > { %p11_p4 = scmp.ge.s32.totalorder %s14_s15, 4  }
  0x1c   :  { %13 = sbr.rel (!%p11_p4) target bundleno = 1 (0x1), region = 69 }

// kernel: basic_block_forward.4
= control target key start
LH: loop header
LB: loop body
LE: loop exit
PB: predicated region body
PF: predicated region fallthrough
CT: control target
= control target key end

     0   :  { %s731_s21 = smov 0   ;;  %s818_s0 = inlined_call_operand.vmem [shape: f32[2,16,64], index: 0, kind: input, shape index: {}]   ;;  %s819_s1 = inlined_call_operand.vmem [shape: f32[1,64], index: 1, kind: input, shape index: {}]   ;;  %s820_s2 = inlined_call_operand.vmem [shape: f32[1,64], index: 2, kind: input, shape index: {}]   ;;  %s821_s3 = inlined_call_operand.vmem [shape: bf16[3,64,64], index: 3, kind: input, shape index: {}]   ;;  %s822_s4 = inlined_call_operand.vmem [shape: f32[2,16,64], index: 4, kind: output, shape index: {0}]   ;;  %s823_s5 = inlined_call_operand.vmem [shape: f32[2,1,64], index: 5, kind: output, shape index: {1}]   ;;  %s824_s6 = inlined_call_operand.vmem [shape: f32[2,1,64], index: 6, kind: output, shape index: {2}]  }
   0x1 LB: > { %s586_s22 = sadd.s32 4294967295, %s694_s21   ;;  %p590_p0 = scmp.ge.s32.totalorder %s694_s21, 1  ;;  %s694_s21 = sphi %s731_s21, %s17_s21  }
   0x2   : > { %p217_p1 = scmp.lt.s32.totalorder %s694_s21, 3 }
   0x4   : > { %p218_p2 = pnand %p590_p0, %p217_p1 }
   0x5   : > { %p253_p3 = scmp.lt.s32.totalorder (!%p218_p2), %s586_s22, 1 }
   0x6   : > { %221 = sbr.rel (%p218_p2) target bundleno = 208 (0xd0), region = 36 }
   0xb   : > { %v669_v0 = vld [vmem:[%s821_s3 + $0x38] sm:$0xff]  ;;  %v668_v3 = vld [vmem:[%s821_s3 + $0x30] sm:$0xff]  ;;  %s826_s22 = smov (!%p253_p3, %s586_s22), 1  ;;  %v686_v6 = vld [vmem:[%s819_s1] ss:$0 sm:$0xff]  ;;  %vm320_vm0 = vcmask 523264  }
   0xc   : > { %v673_v1 = vld [vmem:[%s821_s3 + $0x18] sm:$0xff]  ;;  %328 = vmatpush.bf16.msra.mxu0 %v669_v0  ;;  %v672_v4 = vld [vmem:[%s821_s3 + $0x10] sm:$0xff]  ;;  %s664_s11 = sshll.u32 %s826_s22, 4  ;;  %v667_v7 = vld [vmem:[%s821_s3 + $0x28] sm:$0xff]  ;;  %vm438_vm1 = vcmask 522240   ;;  %vm444_vm2 = vcmask 1046528   ;;  %s265_s14 = scalar_lea.vmem %s823_s5, %s826_s22 }
   0xd   : > { %v677_v2 = vld [vmem:[%s821_s3 + $0x58] sm:$0xff]  ;;  %376 = vmatpush.bf16.msra.mxu1 %v673_v1  ;;  %v676_v5 = vld [vmem:[%s821_s3 + $0x50] sm:$0xff]  ;;  %s257_s18 = scalar_lea.vmem %s818_s0, %s664_s11  ;;  %v687_v8 = vld [vmem:[%s820_s2] ss:$0 sm:$0xff]  ;;  %s262_s12 = scalar_lea.vmem %s822_s4, %s664_s11  ;;  %vm467_vm3 = vcmask 516096  }
   0xe   : > { %423 = vmatpush.bf16.msra.mxu2 %v677_v2  ;;  %v671_v9 = vld [vmem:[%s821_s3 + $0x8] sm:$0xff]  ;;  %v270_v10 = vld [vmem:[%s257_s18] sm:$0xff]  ;;  %s268_s17 = scalar_lea.vmem %s824_s6, %s826_s22 }
   0xf   : > { %v271_v11 = vld [vmem:[%s257_s18 + $0x8] sm:$0xff]  ;;  %v276_v13 = vmul.f32 %v686_v6, %v270_v10  ;;  %v666_v17 = vld [vmem:[%s821_s3 + $0x20] sm:$0xff] }
  0x10   : > { %329 = vmatpush.bf16.msra.mxu0 %v668_v3  ;;  %v675_v12 = vld [vmem:[%s821_s3 + $0x48] sm:$0xff]  ;;  %v277_v14 = vmul.f32 %v686_v6, %v271_v11  ;;  %v670_v18 = vld [vmem:[%s821_s3] sm:$0xff] }
  0x11   : > { %377 = vmatpush.bf16.msra.mxu1 %v672_v4  ;;  %v282_v15 = vadd.f32 %v687_v8, %v276_v13  ;;  %v674_v19 = vld [vmem:[%s821_s3 + $0x40] sm:$0xff] }
  0x12   : > { %424 = vmatpush.bf16.msra.mxu2 %v676_v5  ;;  %v283_v16 = vadd.f32 %v687_v8, %v277_v14 }
  0x13   : > { %v284_v20 = vmax.f32 %v282_v15, 0.0 }
  0x14   : > { %330 = vmatpush.bf16.msra.mxu0 %v667_v7  ;;  %v285_v21 = vmax.f32 %v283_v16, 0.0 }
  0x15   : > { %378 = vmatpush.bf16.msra.mxu1 %v671_v9 }
  0x16   : > { %425 = vmatpush.bf16.msra.mxu2 %v675_v12  ;;  %v286_v22 = vpack.c.bf16 %v285_v21, %v284_v20 }
  0x18   : > { %331 = vmatpush.bf16.msra.mxu0 %v666_v17 }
  0x19   : > { %379 = vmatpush.bf16.msra.mxu1 %v670_v18 }
  0x1a   : > { %426 = vmatpush.bf16.msra.mxu2 %v674_v19 }
  0x1b   : > { %619 = vmatmul.msk.bf16.vlgmr.msra.gmra.mxu0 %vm320_vm0, %v286_v22 }
  0x1c   : > { %636 = vmatmul.msk.bf16.vlgmr.msra.gmra.mxu1 %vm320_vm0, %v286_v22 }
  0x1d   : > { %661 = vmatmul.msk.bf16.vlgmr.msra.gmra.mxu2 %vm320_vm0, %v286_v22 }
  0x98   : > { %v333_v23 = vpop.f32.mrf.mxu0 }
  0x99   : > { %338 = vst.msk [vmem:[#allocation2] sm:$0xff] %vm320_vm0, %v333_v23  ;;  %v381_v24 = vpop.f32.mrf.mxu1 }
  0xa0   : > { %v335_v25 = vpop.f32.mrf.mxu0  ;;  %v428_v26 = vpop.f32.mrf.mxu2 }
  0xa1   : > { %339 = vst.msk [vmem:[#allocation2 + $0x8] sm:$0xff] %vm320_vm0, %v335_v25  ;;  %v383_v28 = vpop.f32.mrf.mxu1  ;;  %v445_v33 = vrot.slane %v428_v26, 1 }
  0xa8   : > { %v433_v27 = vld [vmem:[#allocation2 + $0x1] sm:$0xff]  ;;  %v434_v29 = vld [vmem:[#allocation2 + $0x9] sm:$0x7f]  ;;  %v430_v32 = vpop.f32.mrf.mxu2 }
  0xa9   : > { %v435_v30 = vadd.f32 %v433_v27, %v381_v24  ;;  %v436_v31 = vadd.f32 %v434_v29, %v383_v28  ;;  %v446_v34 = vrot.slane %v430_v32, 1 }
  0xab   : > { %437 = vst.msk [vmem:[#allocation2 + $0x1] sm:$0xff] %vm320_vm0, %v435_v30  ;;  %v447_v36 = vsel %vm444_vm2, %v445_v33, %v446_v34 }
  0xac   : > { %439 = vst.msk [vmem:[#allocation2 + $0x9] sm:$0x7f] %vm438_vm1, %v436_v31 }
  0xb2   : > { %v440_v35 = vld [vmem:[#allocation2] sm:$0xff] }
  0xb3   : > { %v441_v37 = vld [vmem:[#allocation2 + $0x8] sm:$0x7f]  ;;  %v450_v38 = vadd.f32 %v447_v36, %v440_v35 }
  0xb4   : > { %v451_v39 = vadd.f32 %v446_v34, %v441_v37 }
  0xb5   : > { %452 = vst.msk [vmem:[#allocation2] sm:$0xff] %vm320_vm0, %v450_v38 }
  0xb6   : > { %453 = vst.msk [vmem:[#allocation2 + $0x8] sm:$0x7f] %vm438_vm1, %v451_v39 }
  0xbc   : > { %v454_v40 = vld [vmem:[#allocation2] sm:$0xff] }
  0xbd   : > { %v455_v41 = vld [vmem:[#allocation2 + $0x8] sm:$0xff]  ;;  %456 = vst.msk [vmem:[%s262_s12] sm:$0xff] %vm320_vm0, %v454_v40  ;;  %v458_v42 = vsel %vm320_vm0, %v454_v40, 0.0  ;;  %v469_v43 = vmul.f32 %v454_v40, %v454_v40 }
  0xbe   : > { %457 = vst.msk [vmem:[%s262_s12 + $0x8] sm:$0xff] %vm320_vm0, %v455_v41  ;;  %v459_v44 = vsel %vm320_vm0, %v455_v41, 0.0  ;;  %v470_v45 = vmul.f32 %v455_v41, %v455_v41 }
  0xbf   : > { %v460_v46 = vadd.f32 %v459_v44, %v458_v42  ;;  %v471_v47 = vsel %vm320_vm0, %v469_v43, 0.0 }
  0xc0   : > { %v472_v48 = vsel %vm320_vm0, %v470_v45, 0.0 }
  0xc1   : > { %v461_v49 = vrot.slane %v460_v46, 4  ;;  %v473_v50 = vadd.f32 %v472_v48, %v471_v47 }
  0xc3   : > { %v462_v51 = vadd.f32 %v461_v49, %v460_v46  ;;  %v474_v52 = vrot.slane %v473_v50, 4 }
  0xc5   : > { %v463_v53 = vrot.slane %v462_v51, 2  ;;  %v475_v54 = vadd.f32 %v474_v52, %v473_v50 }
  0xc7   : > { %v464_v55 = vadd.f32 %v463_v53, %v462_v51  ;;  %v476_v56 = vrot.slane %v475_v54, 2 }
  0xc9   : > { %v465_v57 = vrot.slane %v464_v55, 1  ;;  %v477_v58 = vadd.f32 %v476_v56, %v475_v54 }
  0xcb   : > { %v466_v59 = vadd.f32 %v465_v57, %v464_v55  ;;  %v478_v60 = vrot.slane %v477_v58, 1 }
  0xcd   : > { %468 = vst.msk [vmem:[%s265_s14] sm:$0x1] %vm467_vm3, %v466_v59  ;;  %v479_v61 = vadd.f32 %v478_v60, %v477_v58 }
  0xcf   : > { %480 = vst.msk [vmem:[%s268_s17] sm:$0x1] %vm467_vm3, %v479_v61 }
  0xd0 PF: > { %s17_s21 = sadd.s32 1, %s694_s21  }
  0xd1   : > { %p14_p4 = scmp.ge.s32.totalorder %s17_s21, 4  }
  0xd3   :  { %16 = sbr.rel (!%p14_p4) target bundleno = 1 (0x1), region = 92 }

</bundles_post_ra>
